<compile_context>
chip_gen: v5e
topology: v5e:2x2
jax: 0.10.0
libtpu: 0.0.40
codegen_flags: <defaults>
</compile_context>

<pallas_src>
import functools

import jax
import jax.numpy as jnp
from jax.experimental import pallas as pl
from jax.experimental.pallas import tpu as pltpu

CLIP_VAL = 5.0
BN_EPS = 1e-5
LANE = 128


def _round_up(x, m):
    return ((x + m - 1) // m) * m


# --------------------------------------------------------------------------
# Kernel: one batch tile per grid step. BN stats + fused weights are resident.
# --------------------------------------------------------------------------
def rnd_kernel(mean_ref, isd_ref,
               w1_ref, b1_ref, w2_ref, b2_ref, w3_ref, b3_ref,
               obs_ref, err_ref, *, inv_rep_dim):
    # BatchNorm1d normalize (stats precomputed over the FULL batch) + clamp, f32.
    x = (obs_ref[...] - mean_ref[...]) * isd_ref[...]
    x = jnp.clip(x, -CLIP_VAL, CLIP_VAL).astype(jnp.bfloat16)

    # Fused layer 1: [pred_h1 || tgt_h1]  (bf16 operands, f32 accumulation).
    h = jnp.dot(x, w1_ref[...], preferred_element_type=jnp.float32) + b1_ref[...]
    h = jnp.maximum(h, 0.0).astype(jnp.bfloat16)

    # Fused layer 2: block-diagonal -> [pred_h2 || tgt_h2].
    h = jnp.dot(h, w2_ref[...], preferred_element_type=jnp.float32) + b2_ref[...]
    h = jnp.maximum(h, 0.0).astype(jnp.bfloat16)

    # Fused layer 3 computes (target - prediction) directly; padded output
    # columns are exactly zero so they do not perturb the sum of squares.
    diff = jnp.dot(h, w3_ref[...], preferred_element_type=jnp.float32) + b3_ref[...]

    err = jnp.sum(diff * diff, axis=-1, keepdims=True) * inv_rep_dim  # (TB, 1)
    # Lane-dense store: broadcast the per-row error across the 128 lanes.
    err_ref[...] = jnp.broadcast_to(err, err_ref.shape)


# --------------------------------------------------------------------------
# Parameter packing (done once, outside the kernel).
# --------------------------------------------------------------------------
def pack_params(params, obs_dim, hidden_dim, rnd_rep_dim):
    """Fuse predictor+target weights into 3 lane-aligned bf16 slabs + f32 biases."""
    D, H, R = obs_dim, hidden_dim, rnd_rep_dim
    Dp = _round_up(D, LANE)
    HF = 2 * H
    HFp = _round_up(HF, LANE)
    Rp = _round_up(R, LANE)

    w1 = jnp.zeros((Dp, HFp), jnp.float32)
    w1 = w1.at[:D, :H].set(params["pw1"]).at[:D, H:HF].set(params["tw1"])
    b1 = jnp.zeros((1, HFp), jnp.float32)
    b1 = b1.at[:, :H].set(params["pb1"]).at[:, H:HF].set(params["tb1"])

    w2 = jnp.zeros((HFp, HFp), jnp.float32)
    w2 = w2.at[:H, :H].set(params["pw2"]).at[H:HF, H:HF].set(params["tw2"])
    b2 = jnp.zeros((1, HFp), jnp.float32)
    b2 = b2.at[:, :H].set(params["pb2"]).at[:, H:HF].set(params["tb2"])

    # Final layer fused to emit (target - prediction) in one matmul.
    w3 = jnp.zeros((HFp, Rp), jnp.float32)
    w3 = w3.at[:H, :R].set(-params["pw3"]).at[H:HF, :R].set(params["tw3"])
    b3 = jnp.zeros((1, Rp), jnp.float32)
    b3 = b3.at[:, :R].set(params["tb3"] - params["pb3"])

    return {
        "w1": w1.astype(jnp.bfloat16), "b1": b1,
        "w2": w2.astype(jnp.bfloat16), "b2": b2,
        "w3": w3.astype(jnp.bfloat16), "b3": b3,
        "dims": (D, H, R, Dp, HFp, Rp),
    }


# --------------------------------------------------------------------------
# Wrapper: BN stats in pure JAX (tiny), batch-tiled pallas_call.
# --------------------------------------------------------------------------
def rnd_forward(obs, packed, *, tile_b=128):
    B, D = obs.shape
    D_, H, R, Dp, HFp, Rp = packed["dims"]
    assert D == D_, (D, D_)

    # BatchNorm1d training-mode statistics over the FULL real batch
    # (biased variance), computed outside the tiled kernel so tiling does
    # not change semantics.
    obs = obs.astype(jnp.float32)
    mean = jnp.mean(obs, axis=0, keepdims=True)
    var = jnp.mean(jnp.square(obs - mean), axis=0, keepdims=True)
    inv_std = jax.lax.rsqrt(var + BN_EPS)
    mean_p = jnp.zeros((1, Dp), jnp.float32).at[:, :D].set(mean)
    isd_p = jnp.zeros((1, Dp), jnp.float32).at[:, :D].set(inv_std)

    # Batch tiling: pad B up to a multiple of the tile; padded rows are junk
    # and are sliced off the output.
    tb = min(tile_b, _round_up(B, 8))
    Bp = _round_up(B, tb)
    obs_p = jnp.zeros((Bp, Dp), jnp.float32).at[:B, :D].set(obs)

    grid = (Bp // tb,)
    resident = lambda i: (0, 0)   # same block every step -> DMA'd once, stays in VMEM

    kernel = functools.partial(rnd_kernel, inv_rep_dim=1.0 / float(R))

    err_padded = pl.pallas_call(
        kernel,
        out_shape=jax.ShapeDtypeStruct((Bp, LANE), jnp.float32),
        grid_spec=pltpu.PrefetchScalarGridSpec(
            num_scalar_prefetch=0,
            grid=grid,
            in_specs=[
                pl.BlockSpec((1, Dp), resident),        # mean
                pl.BlockSpec((1, Dp), resident),        # inv_std
                pl.BlockSpec((Dp, HFp), resident),      # w1 (fused, bf16)
                pl.BlockSpec((1, HFp), resident),       # b1
                pl.BlockSpec((HFp, HFp), resident),     # w2 (block-diag, bf16)
                pl.BlockSpec((1, HFp), resident),       # b2
                pl.BlockSpec((HFp, Rp), resident),      # w3 (diff-fused, bf16)
                pl.BlockSpec((1, Rp), resident),        # b3
                pl.BlockSpec((tb, Dp), lambda i: (i, 0)),   # obs tile
            ],
            out_specs=pl.BlockSpec((tb, LANE), lambda i: (i, 0)),
        ),
        compiler_params=pltpu.CompilerParams(
            dimension_semantics=("parallel",),   # v7x: shard batch tiles across 2 TCs
        ),
    )(mean_p, isd_p,
      packed["w1"], packed["b1"], packed["w2"], packed["b2"],
      packed["w3"], packed["b3"],
      obs_p)

    # Column 0 holds the per-row error; drop batch padding.
    return err_padded[:B, :1]


# --------------------------------------------------------------------------
# Synthetic parameters (stand-in for utils.weight_init) + pure-JAX reference.
# --------------------------------------------------------------------------
def make_params(key, obs_dim, hidden_dim, rnd_rep_dim):
    ks = jax.random.split(key, 12)

    def lin(kw, fan_in, fan_out):
        # weights stored (in, out) so the kernel computes x @ W + b
        # (equivalent to PyTorch x @ W.T with W (out, in)).
        return jax.random.normal(kw, (fan_in, fan_out), jnp.float32) / jnp.sqrt(
            jnp.float32(fan_in))

    return {
        "pw1": lin(ks[0], obs_dim, hidden_dim),
        "pb1": jax.random.normal(ks[1], (1, hidden_dim), jnp.float32) * 0.01,
        "pw2": lin(ks[2], hidden_dim, hidden_dim),
        "pb2": jax.random.normal(ks[3], (1, hidden_dim), jnp.float32) * 0.01,
        "pw3": lin(ks[4], hidden_dim, rnd_rep_dim),
        "pb3": jax.random.normal(ks[5], (1, rnd_rep_dim), jnp.float32) * 0.01,
        "tw1": lin(ks[6], obs_dim, hidden_dim),
        "tb1": jax.random.normal(ks[7], (1, hidden_dim), jnp.float32) * 0.01,
        "tw2": lin(ks[8], hidden_dim, hidden_dim),
        "tb2": jax.random.normal(ks[9], (1, hidden_dim), jnp.float32) * 0.01,
        "tw3": lin(ks[10], hidden_dim, rnd_rep_dim),
        "tb3": jax.random.normal(ks[11], (1, rnd_rep_dim), jnp.float32) * 0.01,
    }


def rnd_reference(obs, params):
    """Pure-JAX f32 reference (matches the PyTorch module)."""
    mean = jnp.mean(obs, axis=0, keepdims=True)
    c = obs - mean
    var = jnp.mean(c * c, axis=0, keepdims=True)
    x = jnp.clip(c * jax.lax.rsqrt(var + BN_EPS), -CLIP_VAL, CLIP_VAL)

    def mlp(x, w1, b1, w2, b2, w3, b3):
        h = jnp.maximum(x @ w1 + b1, 0.0)
        h = jnp.maximum(h @ w2 + b2, 0.0)
        return h @ w3 + b3

    pred = mlp(x, params["pw1"], params["pb1"], params["pw2"], params["pb2"],
               params["pw3"], params["pb3"])
    tgt = mlp(x, params["tw1"], params["tb1"], params["tw2"], params["tb2"],
              params["tw3"], params["tb3"])
    return jnp.mean(jnp.square(tgt - pred), axis=-1, keepdims=True)


if __name__ == "__main__":
    # Small, deliberately non-128-aligned shapes to exercise the padding path.
    B, OBS_DIM, HIDDEN_DIM, RND_REP_DIM = 200, 24, 64, 40

    key = jax.random.PRNGKey(0)
    k_obs, k_par = jax.random.split(key)
    obs = jax.random.normal(k_obs, (B, OBS_DIM), jnp.float32) * 2.0 + 0.5
    params = make_params(k_par, OBS_DIM, HIDDEN_DIM, RND_REP_DIM)
    packed = pack_params(params, OBS_DIM, HIDDEN_DIM, RND_REP_DIM)

    err = rnd_forward(obs, packed)
    err = jax.block_until_ready(err)

    ref = rnd_reference(obs, params)
    assert err.shape == (B, 1), err.shape
    # bf16 MXU operands vs f32 reference -> loosened tolerance (per review).
    assert jnp.allclose(err, ref, rtol=5e-2, atol=1e-3), (
        float(jnp.max(jnp.abs(err - ref))), float(jnp.max(jnp.abs(ref))))

    print("KERNEL_OK")
</pallas_src>

<mosaic_0001>
module attributes {stable_mosaic.version = 11 : i64} {
  func.func @rnd_kernel(%arg0: i32, %arg1: memref<1x128xf32, #tpu.memory_space<vmem>>, %arg2: memref<1x128xf32, #tpu.memory_space<vmem>>, %arg3: memref<128x128xbf16, #tpu.memory_space<vmem>>, %arg4: memref<1x128xf32, #tpu.memory_space<vmem>>, %arg5: memref<128x128xbf16, #tpu.memory_space<vmem>>, %arg6: memref<1x128xf32, #tpu.memory_space<vmem>>, %arg7: memref<128x128xbf16, #tpu.memory_space<vmem>>, %arg8: memref<1x128xf32, #tpu.memory_space<vmem>>, %arg9: memref<128x128xf32, #tpu.memory_space<vmem>>, %arg10: memref<128x128xf32, #tpu.memory_space<vmem>>) attributes {dimension_semantics = [#tpu.dimension_semantics<parallel>], iteration_bounds = array<i64: 2>, scalar_prefetch = 0 : i64, scratch_operands = 0 : i64, tpu.core_type = #tpu.core_type<tc>, window_params = [{pipeline_mode = #tpu.pipeline_mode<synchronous>, transform_indices = @transform_0, window_bounds = array<i64: 1, 128>}, {pipeline_mode = #tpu.pipeline_mode<synchronous>, transform_indices = @transform_1, window_bounds = array<i64: 1, 128>}, {pipeline_mode = #tpu.pipeline_mode<synchronous>, transform_indices = @transform_2, window_bounds = array<i64: 128, 128>}, {pipeline_mode = #tpu.pipeline_mode<synchronous>, transform_indices = @transform_3, window_bounds = array<i64: 1, 128>}, {pipeline_mode = #tpu.pipeline_mode<synchronous>, transform_indices = @transform_4, window_bounds = array<i64: 128, 128>}, {pipeline_mode = #tpu.pipeline_mode<synchronous>, transform_indices = @transform_5, window_bounds = array<i64: 1, 128>}, {pipeline_mode = #tpu.pipeline_mode<synchronous>, transform_indices = @transform_6, window_bounds = array<i64: 128, 128>}, {pipeline_mode = #tpu.pipeline_mode<synchronous>, transform_indices = @transform_7, window_bounds = array<i64: 1, 128>}, {transform_indices = @transform_8, window_bounds = array<i64: 128, 128>}, {transform_indices = @transform_9, window_bounds = array<i64: 128, 128>}]} {
    %c0 = arith.constant 0 : index
    %c0_0 = arith.constant 0 : index
    %0 = vector.load %arg9[%c0, %c0_0] : memref<128x128xf32, #tpu.memory_space<vmem>>, vector<128x128xf32>
    %c0_1 = arith.constant 0 : index
    %c0_2 = arith.constant 0 : index
    %1 = vector.load %arg1[%c0_1, %c0_2] : memref<1x128xf32, #tpu.memory_space<vmem>>, vector<1x128xf32>
    %2 = vector.broadcast %1 : vector<1x128xf32> to vector<128x128xf32>
    %3 = arith.subf %0, %2 : vector<128x128xf32>
    %c0_3 = arith.constant 0 : index
    %c0_4 = arith.constant 0 : index
    %4 = vector.load %arg2[%c0_3, %c0_4] : memref<1x128xf32, #tpu.memory_space<vmem>>, vector<1x128xf32>
    %5 = vector.broadcast %4 : vector<1x128xf32> to vector<128x128xf32>
    %6 = arith.mulf %3, %5 : vector<128x128xf32>
    %cst = arith.constant -5.000000e+00 : f32
    %cst_5 = arith.constant 5.000000e+00 : f32
    %7 = vector.broadcast %cst : f32 to vector<128x128xf32>
    %8 = arith.maximumf %7, %6 : vector<128x128xf32>
    %9 = vector.broadcast %cst_5 : f32 to vector<128x128xf32>
    %10 = arith.minimumf %9, %8 : vector<128x128xf32>
    %11 = arith.truncf %10 : vector<128x128xf32> to vector<128x128xbf16>
    %c0_6 = arith.constant 0 : index
    %c0_7 = arith.constant 0 : index
    %12 = vector.load %arg3[%c0_6, %c0_7] : memref<128x128xbf16, #tpu.memory_space<vmem>>, vector<128x128xbf16>
    %cst_8 = arith.constant dense<0.000000e+00> : vector<128x128xf32>
    %13 = tpu.matmul %11, %12, %cst_8 {dimension_numbers = #tpu.dot_dimension_numbers<[1], [0], [0], [1], [0, 0, 1, 1], [], []>} : vector<128x128xbf16>, vector<128x128xbf16>, vector<128x128xf32> -> vector<128x128xf32>
    %c0_9 = arith.constant 0 : index
    %c0_10 = arith.constant 0 : index
    %14 = vector.load %arg4[%c0_9, %c0_10] : memref<1x128xf32, #tpu.memory_space<vmem>>, vector<1x128xf32>
    %15 = vector.broadcast %14 : vector<1x128xf32> to vector<128x128xf32>
    %16 = arith.addf %13, %15 : vector<128x128xf32>
    %cst_11 = arith.constant 0.000000e+00 : f32
    %17 = vector.broadcast %cst_11 : f32 to vector<128x128xf32>
    %18 = arith.maximumf %16, %17 : vector<128x128xf32>
    %19 = arith.truncf %18 : vector<128x128xf32> to vector<128x128xbf16>
    %c0_12 = arith.constant 0 : index
    %c0_13 = arith.constant 0 : index
    %20 = vector.load %arg5[%c0_12, %c0_13] : memref<128x128xbf16, #tpu.memory_space<vmem>>, vector<128x128xbf16>
    %cst_14 = arith.constant dense<0.000000e+00> : vector<128x128xf32>
    %21 = tpu.matmul %19, %20, %cst_14 {dimension_numbers = #tpu.dot_dimension_numbers<[1], [0], [0], [1], [0, 0, 1, 1], [], []>} : vector<128x128xbf16>, vector<128x128xbf16>, vector<128x128xf32> -> vector<128x128xf32>
    %c0_15 = arith.constant 0 : index
    %c0_16 = arith.constant 0 : index
    %22 = vector.load %arg6[%c0_15, %c0_16] : memref<1x128xf32, #tpu.memory_space<vmem>>, vector<1x128xf32>
    %23 = vector.broadcast %22 : vector<1x128xf32> to vector<128x128xf32>
    %24 = arith.addf %21, %23 : vector<128x128xf32>
    %cst_17 = arith.constant 0.000000e+00 : f32
    %25 = vector.broadcast %cst_17 : f32 to vector<128x128xf32>
    %26 = arith.maximumf %24, %25 : vector<128x128xf32>
    %27 = arith.truncf %26 : vector<128x128xf32> to vector<128x128xbf16>
    %c0_18 = arith.constant 0 : index
    %c0_19 = arith.constant 0 : index
    %28 = vector.load %arg7[%c0_18, %c0_19] : memref<128x128xbf16, #tpu.memory_space<vmem>>, vector<128x128xbf16>
    %cst_20 = arith.constant dense<0.000000e+00> : vector<128x128xf32>
    %29 = tpu.matmul %27, %28, %cst_20 {dimension_numbers = #tpu.dot_dimension_numbers<[1], [0], [0], [1], [0, 0, 1, 1], [], []>} : vector<128x128xbf16>, vector<128x128xbf16>, vector<128x128xf32> -> vector<128x128xf32>
    %c0_21 = arith.constant 0 : index
    %c0_22 = arith.constant 0 : index
    %30 = vector.load %arg8[%c0_21, %c0_22] : memref<1x128xf32, #tpu.memory_space<vmem>>, vector<1x128xf32>
    %31 = vector.broadcast %30 : vector<1x128xf32> to vector<128x128xf32>
    %32 = arith.addf %29, %31 : vector<128x128xf32>
    %33 = arith.mulf %32, %32 : vector<128x128xf32>
    %cst_23 = arith.constant dense<0.000000e+00> : vector<128xf32>
    %34 = vector.multi_reduction <add>, %33, %cst_23 [1] : vector<128x128xf32> to vector<128xf32>
    %35 = vector.shape_cast %34 : vector<128xf32> to vector<128x1xf32>
    %cst_24 = arith.constant 2.500000e-02 : f32
    %36 = vector.broadcast %cst_24 : f32 to vector<128x1xf32>
    %37 = arith.mulf %35, %36 : vector<128x1xf32>
    %38 = vector.shape_cast %37 : vector<128x1xf32> to vector<128x1xf32>
    %39 = vector.broadcast %38 : vector<128x1xf32> to vector<128x128xf32>
    %c0_25 = arith.constant 0 : index
    %c0_26 = arith.constant 0 : index
    %40 = vector.load %arg10[%c0_25, %c0_26] : memref<128x128xf32, #tpu.memory_space<vmem>>, vector<128x128xf32>
    tpu.vector_store %arg10[%c0_25, %c0_26], %39 {strides = array<i32>} : memref<128x128xf32, #tpu.memory_space<vmem>>, vector<128x128xf32>,
    return
  }
  func.func @transform_0(%arg0: i32) -> (i32, i32) {
    %c0_i32 = arith.constant 0 : i32
    %c0_i32_0 = arith.constant 0 : i32
    %c0_i32_1 = arith.constant 0 : i32
    return %c0_i32, %c0_i32_0 : i32, i32
  }
  func.func @transform_1(%arg0: i32) -> (i32, i32) {
    %c0_i32 = arith.constant 0 : i32
    %c0_i32_0 = arith.constant 0 : i32
    %c0_i32_1 = arith.constant 0 : i32
    return %c0_i32, %c0_i32_0 : i32, i32
  }
  func.func @transform_2(%arg0: i32) -> (i32, i32) {
    %c0_i32 = arith.constant 0 : i32
    %c0_i32_0 = arith.constant 0 : i32
    %c0_i32_1 = arith.constant 0 : i32
    return %c0_i32, %c0_i32_0 : i32, i32
  }
  func.func @transform_3(%arg0: i32) -> (i32, i32) {
    %c0_i32 = arith.constant 0 : i32
    %c0_i32_0 = arith.constant 0 : i32
    %c0_i32_1 = arith.constant 0 : i32
    return %c0_i32, %c0_i32_0 : i32, i32
  }
  func.func @transform_4(%arg0: i32) -> (i32, i32) {
    %c0_i32 = arith.constant 0 : i32
    %c0_i32_0 = arith.constant 0 : i32
    %c0_i32_1 = arith.constant 0 : i32
    return %c0_i32, %c0_i32_0 : i32, i32
  }
  func.func @transform_5(%arg0: i32) -> (i32, i32) {
    %c0_i32 = arith.constant 0 : i32
    %c0_i32_0 = arith.constant 0 : i32
    %c0_i32_1 = arith.constant 0 : i32
    return %c0_i32, %c0_i32_0 : i32, i32
  }
  func.func @transform_6(%arg0: i32) -> (i32, i32) {
    %c0_i32 = arith.constant 0 : i32
    %c0_i32_0 = arith.constant 0 : i32
    %c0_i32_1 = arith.constant 0 : i32
    return %c0_i32, %c0_i32_0 : i32, i32
  }
  func.func @transform_7(%arg0: i32) -> (i32, i32) {
    %c0_i32 = arith.constant 0 : i32
    %c0_i32_0 = arith.constant 0 : i32
    %c0_i32_1 = arith.constant 0 : i32
    return %c0_i32, %c0_i32_0 : i32, i32
  }
  func.func @transform_8(%arg0: i32) -> (i32, i32) {
    %c0_i32 = arith.constant 0 : i32
    %c0_i32_0 = arith.constant 0 : i32
    return %arg0, %c0_i32 : i32, i32
  }
  func.func @transform_9(%arg0: i32) -> (i32, i32) {
    %c0_i32 = arith.constant 0 : i32
    %c0_i32_0 = arith.constant 0 : i32
    return %arg0, %c0_i32 : i32, i32
  }
}

</mosaic_0001>

<bundles_post_ra>
// kernel: tpu_custom_call.1
= control target key start
LH: loop header
LB: loop body
LE: loop exit
PB: predicated region body
PF: predicated region fallthrough
CT: control target
= control target key end

     0   :  { %s2043_s0 = inlined_call_operand.hbm [shape: f32[1,128], index: 0, kind: input, shape index: {}]   ;;  %s2044_s1 = inlined_call_operand.hbm [shape: f32[1,128], index: 1, kind: input, shape index: {}]   ;;  %s2045_s2 = inlined_call_operand.hbm [shape: bf16[128,128], index: 2, kind: input, shape index: {}]   ;;  %s2046_s3 = inlined_call_operand.vmem [shape: f32[1,128], index: 3, kind: input, shape index: {}]   ;;  %s2047_s4 = inlined_call_operand.hbm [shape: bf16[128,128], index: 4, kind: input, shape index: {}]   ;;  %s2048_s5 = inlined_call_operand.vmem [shape: f32[1,128], index: 5, kind: input, shape index: {}]   ;;  %s2049_s6 = inlined_call_operand.hbm [shape: bf16[128,128], index: 6, kind: input, shape index: {}]   ;;  %s2050_s7 = inlined_call_operand.vmem [shape: f32[1,128], index: 7, kind: input, shape index: {}]   ;;  %s2051_s8 = inlined_call_operand.hbm [shape: f32[256,128], index: 8, kind: input, shape index: {}]   ;;  %s2052_s9 = inlined_call_operand.hbm [shape: f32[256,128], index: 9, kind: output, shape index: {}]  }
   0x1   :  { %2053 = sst [smem:[#allocation19_spill]] %s2043_s0 }
   0x2   :  { %2054 = sst [smem:[#allocation20_spill]] %s2044_s1 }
   0x3   :  { %2055 = sst [smem:[#allocation21_spill]] %s2045_s2 }
   0x4   :  { %2056 = sst [smem:[#allocation22_spill]] %s2047_s4 }
   0x5   :  { %14 = vsyncpa [#allocation3], 0 }
   0x6   :  { %15 = vsyncpa [#allocation6], 0 }
   0x7   :  { %16 = vsyncpa [#allocation9], 0 }
   0x8   :  { %17 = vsyncpa [#allocation12], 0 }
   0x9   :  { %19 = vsyncpa [#allocation12 + $0x1], 0 }
   0xa   :  { %20 = vsyncpa [#allocation4], 0 }
   0xb   :  { %22 = vsyncpa [#allocation4 + $0x1], 0  ;;  %s1763_s30 = smov 0   ;;  %s1765_s10 = smov 0  }
   0xc   :  { %s1767_s11 = smov 0   ;;  %s1769_s12 = smov 0  }
   0xd LB: > { %s2057_s1 = sld [smem:[#allocation20_spill]]  ;;  %s1787_s16 = sadd.s32 4294967295, %s1700_s12   ;;  %s1700_s12 = sphi %s1769_s12, %s2072_s12   ;;  %s1696_s11 = sphi %s1767_s11, %s2071_s11   ;;  %s1692_s10 = sphi %s1765_s10, %s2070_s10   ;;  %s1688_s30 = sphi %s1763_s30, %s2069_s30  }
   0xe   : > { %p1149_p0 = scmp.ge.s32.totalorder %s1700_s12, 1  ;;  %p217_p1 = scmp.eq.s32.totalorder %s1787_s16, 0 }
   0xf   : > { %p253_p2 = scmp.lt.s32.totalorder %s1700_s12, 3  ;;  %s1702_s18 = smov [#allocation5]  }
  0x10   : > { %s279_s19 = sshll.u32 %s1702_s18, 4  ;;  %s2059_s4 = sld [smem:[#allocation22_spill]]  ;;  %s280_s19 = int_to_ptr.vmem [resolvable:$true] %s279_s19 }
  0x11   : > { %p1792_p3 = pnand %p1149_p0, %p253_p2  ;;  %s2061_s0 = sld [smem:[#allocation19_spill]] }
  0x12   : > { %s1703_s27 = smov [#allocation8]   ;;  %s1704_s29 = smov 64  }
  0x13   : > { %s277_s15 = sshll.u32 %s2057_s1, 4  ;;  %p1358_p5 = pneg %p1792_p3  ;;  %s278_s15 = int_to_ptr.hbm [resolvable:$true] %s277_s15 }
  0x14   : > { %s307_s28 = sshll.u32 %s1703_s27, 4  ;;  %s1705_s13 = smov 4   ;;  %s308_s28 = int_to_ptr.vmem [resolvable:$true] %s307_s28 }
  0x15   : > { %p1804_p6 = pnand %p1358_p5, %p217_p1  ;;  %s2062_s2 = sld [smem:[#allocation21_spill]] }
  0x16   : > { %s305_s22 = sshll.u32 %s2059_s4, 4  ;;  %s1706_s21 = smov [#allocation2]   ;;  %s306_s22 = int_to_ptr.hbm [resolvable:$true] %s305_s22 }
  0x17   : > { %s265_s26 = sshll.u32 %s2061_s0, 4  ;;  %s267_s24 = sshll.u32 %s1706_s21, 4  ;;  %s266_s26 = int_to_ptr.hbm [resolvable:$true] %s265_s26  ;;  %s268_s24 = int_to_ptr.vmem [resolvable:$true] %s267_s24 }
  0x18   : > { %1364 = dma.hbm_to_vmem [thread:$0]  (!%p1804_p6), %s278_s15, 16, %s280_s19, [#allocation6]  }
  0x19   : > { %1370 = dma.hbm_to_vmem [thread:$0]  (!%p1804_p6), %s306_s22, 1024, %s308_s28, [#allocation9], %s1704_s29, %s1704_s29, %s1705_s13  }
  0x1a   : > { %1361 = dma.hbm_to_vmem [thread:$0]  (!%p1804_p6), %s266_s26, 16, %s268_s24, [#allocation3]  }
  0x1b   : > { %s288_s20 = sshll.u32 %s2062_s2, 4  ;;  %s1707_s15 = smov [#allocation7]   ;;  %s289_s20 = int_to_ptr.hbm [resolvable:$true] %s288_s20 }
  0x1c   : > { %s290_s19 = sshll.u32 %s1707_s15, 4  ;;  %s322_s27 = sshll.u32 %s2049_s6, 4  ;;  %s291_s19 = int_to_ptr.vmem [resolvable:$true] %s290_s19  ;;  %s323_s27 = int_to_ptr.hbm [resolvable:$true] %s322_s27 }
  0x1d   : > { %1367 = dma.hbm_to_vmem [thread:$0]  (!%p1804_p6), %s289_s20, 1024, %s291_s19, [#allocation6], %s1704_s29, %s1704_s29, %s1705_s13  }
  0x1e   : > { %s1708_s28 = smov [#allocation10]   ;;  %s1148_s26 = sadd.s32 4294967294, %s1700_s12  }
  0x1f   : > { %s324_s14 = sshll.u32 %s1708_s28, 4  ;;  %s1829_s18 = sadd.s32 1, %s1700_s12   ;;  %s325_s14 = int_to_ptr.vmem [resolvable:$true] %s324_s14 }
  0x20   : > { %1373 = dma.hbm_to_vmem [thread:$0]  (!%p1804_p6), %s323_s27, 1024, %s325_s14, [#allocation9], %s1704_s29, %s1704_s29, %s1705_s13  }
  0x21   : > { %s203_s21 = sadd.s32 1, %s1696_s11  ;;  %s200_s24 = ssub.s32 %s1700_s12, %s1829_s18 }
  0x22   : > { %p210_p7 = scmp.ne.s32.totalorder %s1696_s11, %s1692_s10  ;;  %p201_p8 = scmp.eq.s32.totalorder %s200_s24, 0 }
  0x23   : > { %p211_p9 = scmp.eq.s32.totalorder %s1700_s12, 0  ;;  %p216_p10 = scmp.ne.s32.totalorder %s1692_s10, %s1688_s30 }
  0x24   : > { %p240_p11 = scmp.eq.s32.totalorder %s1787_s16, 1  ;;  %p246_p2 = scmp.eq.s32.totalorder %s1148_s26, 1 }
  0x25   : > { %s1841_s20 = scalar_select %p201_p8, %s1696_s11, %s203_s21  }
  0x26   : > { %p1843_p12 = por %p211_p9, %p210_p7  ;;  %p1849_p13 = por %p217_p1, %p216_p10 }
  0x27   : > { %p1853_p0 = por %p240_p11, %p210_p7  ;;  %p1387_p5 = scmp.lt.s32.totalorder %s1700_s12, 2 }
  0x28   : > { %s341_s13 = sand.u32 1, %s1696_s11   ;;  %p1859_p6 = por %p246_p2, %p216_p10 }
  0x29   : > { %s1156_s22 = sshll.u32 %s341_s13, 7  ;;  %s1284_s25 = sshll.u32 %s1700_s12, 7 }
  0x2a   : > { %s350_s14 = scalar_lea.hbm %s2051_s8, %s1284_s25  ;;  %s345_s24 = scalar_lea.vmem [#allocation11], %s1156_s22 }
  0x2b   : > { %s351_s21 = sshll.u32 %s350_s14, 4  ;;  %s353_s0 = sshll.u32 %s345_s24, 4  ;;  %s352_s21 = int_to_ptr.hbm [resolvable:$true] %s351_s21  ;;  %s354_s0 = int_to_ptr.vmem [resolvable:$true] %s353_s0 }
  0x2c   : > { %p1869_p7 = pnand %p1387_p5, %p1843_p12  ;;  %s342_s1 = scalar_lea.sflag [#allocation12], %s341_s13 }
  0x2d   : > { %s1592_s2 = sshra.s32 %s352_s21, 4  ;;  %s1599_s27 = scalar_lea.hbm %s2051_s8, 256  ;;  %s1593_s2 = int_to_ptr.hbm [resolvable:$true] %s1592_s2 }
  0x2e   : > { %s1594_s4 = scalar_lea.hbm %s1593_s2, 128  ;;  %p1596_p9 = pneg %p1869_p7 }
  0x2f   : > { %p1595_p8 = scmp.ne.s32.totalorder %s1593_s2, %s1594_s4  ;;  %p1600_p12 = scmp.lt.s32.totalorder %s1593_s2, %s2051_s8 }
  0x30   : > { %p1601_p2 = scmp.lt.s32.totalorder %s1599_s27, %s1594_s4 }
  0x31   : > { %p1597_p10 = pnand %p1596_p9, %p1595_p8 }
  0x32   : > { %p1602_p5 = por %p1601_p2, %p1600_p12 }
  0x33   : > { %p1598_p11 = pneg %p1597_p10 }
  0x35   : > { %p1603_p4 = pnand %p1602_p5, %p1598_p11 }
  0x37   : > { %1606 = shalt.err (!%p1603_p4)
}
  0x38   : > { %s1709_s13 = smov 128   ;;  %s1710_s14 = smov 8  }
  0x39   : > { %1377 = dma.hbm_to_vmem [thread:$0]  (!%p1869_p7), %s352_s21, 2048, %s354_s0, %s342_s1, %s1709_s13, %s1709_s13, %s1710_s14  }
  0x3a   : > { %365 = sbr.rel (%p1792_p3) target bundleno = 738 (0x2e2), region = 56 }
  0x3f   : > { %1667 = dma.done.wait (%p217_p1), [#allocation3], 16  }
  0x40   : > { %1669 = vsyncadd (%p217_p1), [#allocation3], 4294967280 }
  0x41   : > { %1671 = dma.done.wait (%p217_p1), [#allocation6], 1040  }
  0x42   : > { %1673 = vsyncadd (%p217_p1), [#allocation6], 4294966256 }
  0x43   : > { %1675 = dma.done.wait (%p217_p1), [#allocation9], 2048  }
  0x44   : > { %1677 = vsyncadd (%p217_p1), [#allocation9], 4294965248  ;;  %s1898_s0 = sand.u32 1, %s1692_s10  }
  0x45   : > { %s1165_s1 = sshll.u32 %s1898_s0, 7  ;;  %s393_s2 = scalar_lea.sflag [#allocation12], %s1898_s0 }
  0x46   : > { %s1904_s4 = scalar_lea.vmem [#allocation11], %s1165_s1 }
  0x47   : > { %1679 = dma.done.wait (%p1849_p13), %s393_s2, 2048  }
  0x48   : > { %1681 = vsyncadd (%p1849_p13), %s393_s2, 4294965248  ;;  %v1292_v0 = vld [vmem:[#allocation7 + $0x38] sm:$0xff]  ;;  %v1291_v1 = vld [vmem:[#allocation7 + $0x30] sm:$0xff]  ;;  %s1991_s22 = scalar_lea.vmem [#allocation13], %s1165_s1  ;;  %s1309_s27 = sshll.u32 %s1787_s16, 7 }
  0x49   : > { %598 = vmatpush.bf16.msra.mxu0 %v1292_v0  ;;  %1310 = vmatpush.bf16.msra.mxu3 %v1292_v0  ;;  %v1290_v2 = vld [vmem:[#allocation7 + $0x28] sm:$0xff]  ;;  %v1289_v3 = vld [vmem:[#allocation7 + $0x20] sm:$0xff]  ;;  %v1910_v4 = vld [vmem:[#allocation2] ss:$0 sm:$0xff]  ;;  %s1021_s13 = scalar_lea.hbm %s2052_s9, %s1309_s27  ;;  %s1022_s14 = sshll.u32 %s1991_s22, 4  ;;  %s1023_s14 = int_to_ptr.vmem [resolvable:$true] %s1022_s14 }
  0x4a   : > { %v1288_v5 = vld [vmem:[#allocation7 + $0x18] sm:$0xff]  ;;  %v434_v6 = vld [vmem:[%s1904_s4] sm:$0xff]  ;;  %v435_v7 = vld [vmem:[%s1904_s4 + $0x8] sm:$0xff]  ;;  %s1024_s1 = sshll.u32 %s1021_s13, 4  ;;  %s1010_s2 = scalar_lea.sflag [#allocation4], %s1898_s0  ;;  %s1025_s1 = int_to_ptr.hbm [resolvable:$true] %s1024_s1 }
  0x4b   : > { %v454_v8 = vsub.f32 %v434_v6, %v1910_v4  ;;  %v455_v9 = vsub.f32 %v435_v7, %v1910_v4  ;;  %v1916_v10 = vld [vmem:[#allocation5] ss:$0 sm:$0xff]  ;;  %v446_v11 = vld [vmem:[%s1904_s4 + $0x60] sm:$0xff]  ;;  %v447_v12 = vld [vmem:[%s1904_s4 + $0x68] sm:$0xff]  ;;  %s1636_s16 = sshra.s32 %s1025_s1, 4  ;;  %s1642_s21 = scalar_lea.hbm %s2052_s9, 256  ;;  %s1637_s16 = int_to_ptr.hbm [resolvable:$true] %s1636_s16 }
  0x4c   : > { %v1287_v13 = vld [vmem:[#allocation7 + $0x10] sm:$0xff]  ;;  %v466_v14 = vsub.f32 %v446_v11, %v1910_v4  ;;  %v467_v15 = vsub.f32 %v447_v12, %v1910_v4  ;;  %v1286_v20 = vld [vmem:[#allocation7 + $0x8] sm:$0xff]  ;;  %v1285_v25 = vld [vmem:[#allocation7] sm:$0xff]  ;;  %p1643_p13 = scmp.lt.s32.totalorder %s1637_s16, %s2052_s9 }
  0x4d   : > { %599 = vmatpush.bf16.msra.mxu0 %v1291_v1  ;;  %1311 = vmatpush.bf16.msra.mxu3 %v1291_v1  ;;  %v474_v16 = vmul.f32 %v1916_v10, %v454_v8  ;;  %v475_v17 = vmul.f32 %v1916_v10, %v455_v9  ;;  %v436_v28 = vld [vmem:[%s1904_s4 + $0x10] sm:$0xff]  ;;  %v437_v29 = vld [vmem:[%s1904_s4 + $0x18] sm:$0xff]  ;;  %v438_v41 = vld [vmem:[%s1904_s4 + $0x20] sm:$0xff] }
  0x4e   : > { %v486_v18 = vmul.f32 %v1916_v10, %v466_v14  ;;  %v487_v19 = vmul.f32 %v1916_v10, %v467_v15  ;;  %v456_v30 = vsub.f32 %v436_v28, %v1910_v4  ;;  %v457_v31 = vsub.f32 %v437_v29, %v1910_v4  ;;  %v448_v36 = vld [vmem:[%s1904_s4 + $0x70] sm:$0xff]  ;;  %v449_v37 = vld [vmem:[%s1904_s4 + $0x78] sm:$0xff]  ;;  %v439_v42 = vld [vmem:[%s1904_s4 + $0x28] sm:$0xff] }
  0x4f   : > { %v1167_v21 = vclamps-f32 %v474_v16, 5.0  ;;  %v1168_v22 = vclamps-f32 %v475_v17, 5.0  ;;  %v468_v39 = vsub.f32 %v448_v36, %v1910_v4  ;;  %v469_v40 = vsub.f32 %v449_v37, %v1910_v4  ;;  %v442_v49 = vld [vmem:[%s1904_s4 + $0x40] sm:$0xff]  ;;  %v443_v50 = vld [vmem:[%s1904_s4 + $0x48] sm:$0xff]  ;;  %v440_v0 = vld [vmem:[%s1904_s4 + $0x30] sm:$0xff] }
  0x50   : > { %v1179_v23 = vclamps-f32 %v486_v18, 5.0  ;;  %v1180_v24 = vclamps-f32 %v487_v19, 5.0  ;;  %v476_v32 = vmul.f32 %v1916_v10, %v456_v30  ;;  %v477_v33 = vmul.f32 %v1916_v10, %v457_v31  ;;  %v441_v1 = vld [vmem:[%s1904_s4 + $0x38] sm:$0xff] }
  0x51   : > { %600 = vmatpush.bf16.msra.mxu0 %v1290_v2  ;;  %1312 = vmatpush.bf16.msra.mxu3 %v1290_v2  ;;  %v522_v26 = vpack.c.bf16 %v1168_v22, %v1167_v21  ;;  %v488_v43 = vmul.f32 %v1916_v10, %v468_v39  ;;  %v489_v44 = vmul.f32 %v1916_v10, %v469_v40  ;;  %v445_v6 = vld [vmem:[%s1904_s4 + $0x58] sm:$0xff]  ;;  %v1299_v21 = vld [vmem:[#allocation8 + $0x30] sm:$0xff]  ;;  %v1297_v22 = vld [vmem:[#allocation8 + $0x20] sm:$0xff] }
  0x52   : > { %v528_v27 = vpack.c.bf16 %v1180_v24, %v1179_v23  ;;  %v1169_v34 = vclamps-f32 %v476_v32, 5.0  ;;  %v1170_v35 = vclamps-f32 %v477_v33, 5.0  ;;  %v458_v45 = vsub.f32 %v438_v41, %v1910_v4  ;;  %v1295_v23 = vld [vmem:[#allocation8 + $0x10] sm:$0xff]  ;;  %v1294_v24 = vld [vmem:[#allocation8 + $0x8] sm:$0xff] }
  0x53   : > { %v459_v46 = vsub.f32 %v439_v42, %v1910_v4  ;;  %v1181_v47 = vclamps-f32 %v488_v43, 5.0  ;;  %v1182_v48 = vclamps-f32 %v489_v44, 5.0  ;;  %v462_v51 = vsub.f32 %v442_v49, %v1910_v4 }
  0x54   : > { %v523_v38 = vpack.c.bf16 %v1170_v35, %v1169_v34  ;;  %v463_v52 = vsub.f32 %v443_v50, %v1910_v4  ;;  %v478_v56 = vmul.f32 %v1916_v10, %v458_v45  ;;  %v460_v2 = vsub.f32 %v440_v0, %v1910_v4 }
  0x55   : > { %601 = vmatpush.bf16.msra.mxu0 %v1289_v3  ;;  %1313 = vmatpush.bf16.msra.mxu3 %v1289_v3  ;;  %v529_v53 = vpack.c.bf16 %v1182_v48, %v1181_v47  ;;  %v482_v54 = vmul.f32 %v1916_v10, %v462_v51  ;;  %v479_v57 = vmul.f32 %v1916_v10, %v459_v46 }
  0x56   : > { %v483_v55 = vmul.f32 %v1916_v10, %v463_v52  ;;  %v1171_v61 = vclamps-f32 %v478_v56, 5.0  ;;  %v461_v3 = vsub.f32 %v441_v1, %v1910_v4  ;;  %v465_v8 = vsub.f32 %v445_v6, %v1910_v4  ;;  %v1308_v6 = vld [vmem:[#allocation10 + $0x38] sm:$0xff] }
  0x57   : > { %v1175_v58 = vclamps-f32 %v482_v54, 5.0  ;;  %v1172_v62 = vclamps-f32 %v479_v57, 5.0  ;;  %v480_v12 = vmul.f32 %v1916_v10, %v460_v2  ;;  %880 = vmatpush.bf16.msra.mxu2 %v1308_v6 }
  0x58   : > { %v1176_v59 = vclamps-f32 %v483_v55, 5.0  ;;  %v485_v11 = vmul.f32 %v1916_v10, %v465_v8  ;;  %v1307_v8 = vld [vmem:[#allocation10 + $0x30] sm:$0xff] }
  0x59   : > { %602 = vmatpush.bf16.msra.mxu0 %v1288_v5  ;;  %1314 = vmatpush.bf16.msra.mxu3 %v1288_v5  ;;  %v524_v63 = vpack.c.bf16 %v1172_v62, %v1171_v61  ;;  %v444_v5 = vld [vmem:[%s1904_s4 + $0x50] sm:$0xff]  ;;  %v1173_v17 = vclamps-f32 %v480_v12, 5.0  ;;  %s1638_s4 = scalar_lea.hbm %s1637_s16, 128 }
  0x5a   : > { %v526_v60 = vpack.c.bf16 %v1176_v59, %v1175_v58  ;;  %v464_v7 = vsub.f32 %v444_v5, %v1910_v4  ;;  %v1178_v15 = vclamps-f32 %v485_v11, 5.0  ;;  %v1298_v4 = vld [vmem:[#allocation8 + $0x28] sm:$0xff]  ;;  %p1639_p1 = scmp.ne.s32.totalorder %s1637_s16, %s1638_s4  ;;  %p1644_p7 = scmp.lt.s32.totalorder %s1642_s21, %s1638_s4 }
  0x5b   : > { %881 = vmatpush.bf16.msra.mxu2 %v1307_v8 }
  0x5c   : > { %v484_v9 = vmul.f32 %v1916_v10, %v464_v7  ;;  %p1640_p3 = pnand %p1639_p1, %p1853_p0  ;;  %p1645_p8 = por %p1644_p7, %p1643_p13 }
  0x5d   : > { %603 = vmatpush.bf16.msra.mxu0 %v1287_v13  ;;  %1315 = vmatpush.bf16.msra.mxu3 %v1287_v13  ;;  %v481_v13 = vmul.f32 %v1916_v10, %v461_v3  ;;  %v1296_v10 = vld [vmem:[#allocation8 + $0x18] sm:$0xff] }
  0x5e   : > { %v1177_v14 = vclamps-f32 %v484_v9, 5.0  ;;  %v1306_v9 = vld [vmem:[#allocation10 + $0x28] sm:$0xff]  ;;  %p1641_p4 = pneg %p1640_p3 }
  0x5f   : > { %v1174_v18 = vclamps-f32 %v481_v13, 5.0  ;;  %882 = vmatpush.bf16.msra.mxu2 %v1306_v9 }
  0x60   : > { %v527_v16 = vpack.c.bf16 %v1178_v15, %v1177_v14  ;;  %v1305_v14 = vld [vmem:[#allocation10 + $0x20] sm:$0xff]  ;;  %p1646_p9 = pnand %p1645_p8, %p1641_p4 }
  0x61   : > { %604 = vmatpush.bf16.msra.mxu0 %v1286_v20  ;;  %1316 = vmatpush.bf16.msra.mxu3 %v1286_v20  ;;  %v525_v19 = vpack.c.bf16 %v1174_v18, %v1173_v17  ;;  %v1300_v20 = vld [vmem:[#allocation8 + $0x38] sm:$0xff] }
  0x62   : > { %739 = vmatpush.bf16.msra.mxu1 %v1300_v20 }
  0x63   : > { %883 = vmatpush.bf16.msra.mxu2 %v1305_v14 }
  0x65   : > { %605 = vmatpush.bf16.msra.mxu0 %v1285_v25  ;;  %1317 = vmatpush.bf16.msra.mxu3 %v1285_v25  ;;  %v1293_v25 = vld [vmem:[#allocation8] sm:$0xff] }
  0x66   : > { %740 = vmatpush.bf16.msra.mxu1 %v1299_v21 }
  0x68   : > { %606 = vmatmul.bf16.vlgmr.msra.gmra.mxu0 %v522_v26  ;;  %636 = vmatmul.bf16.vlgmr.msra.gmra.mxu3 %v528_v27  ;;  %v1965_v27 = vld [vmem:[%s2046_s3] ss:$0 sm:$0xff] }
  0x69   : > { %1318 = vmatpush.bf16.msrb.mxu3 %v1300_v20 }
  0x6a   : > { %741 = vmatpush.bf16.msra.mxu1 %v1298_v4 }
  0x6d   : > { %1319 = vmatpush.bf16.msrb.mxu3 %v1299_v21 }
  0x6e   : > { %742 = vmatpush.bf16.msra.mxu1 %v1297_v22 }
  0x71   : > { %1320 = vmatpush.bf16.msrb.mxu3 %v1298_v4 }
  0x72   : > { %743 = vmatpush.bf16.msra.mxu1 %v1296_v10 }
  0x75   : > { %1321 = vmatpush.bf16.msrb.mxu3 %v1297_v22 }
  0x76   : > { %744 = vmatpush.bf16.msra.mxu1 %v1295_v23 }
  0x78   : > { %611 = vmatmul.bf16.gmra.mxu0 %v523_v38  ;;  %641 = vmatmul.bf16.gmra.mxu3 %v529_v53 }
  0x79   : > { %1322 = vmatpush.bf16.msrb.mxu3 %v1296_v10 }
  0x7a   : > { %745 = vmatpush.bf16.msra.mxu1 %v1294_v24 }
  0x7d   : > { %1323 = vmatpush.bf16.msrb.mxu3 %v1295_v23  ;;  %v1304_v23 = vld [vmem:[#allocation10 + $0x18] sm:$0xff] }
  0x7e   : > { %746 = vmatpush.bf16.msra.mxu1 %v1293_v25  ;;  %884 = vmatpush.bf16.msra.mxu2 %v1304_v23 }
  0x81   : > { %1324 = vmatpush.bf16.msrb.mxu3 %v1294_v24  ;;  %v1303_v24 = vld [vmem:[#allocation10 + $0x10] sm:$0xff] }
  0x82   : > { %885 = vmatpush.bf16.msra.mxu2 %v1303_v24 }
  0x85   : > { %1325 = vmatpush.bf16.msrb.mxu3 %v1293_v25  ;;  %v1302_v25 = vld [vmem:[#allocation10 + $0x8] sm:$0xff] }
  0x86   : > { %886 = vmatpush.bf16.msra.mxu2 %v1302_v25 }
  0x88   : > { %616 = vmatmul.bf16.gmra.mxu0 %v524_v63 }
  0x89   : > { %1326 = vmatpush.bf16.msra.mxu3 %v1308_v6 }
  0x8d   : > { %1327 = vmatpush.bf16.msra.mxu3 %v1307_v8 }
  0x91   : > { %1328 = vmatpush.bf16.msra.mxu3 %v1306_v9 }
  0x95   : > { %1329 = vmatpush.bf16.msra.mxu3 %v1305_v14 }
  0x98   : > { %621 = vmatmul.bf16.gmra.mxu0 %v525_v19 }
  0x99   : > { %1330 = vmatpush.bf16.msra.mxu3 %v1304_v23 }
  0x9d   : > { %1331 = vmatpush.bf16.msra.mxu3 %v1303_v24 }
  0xa1   : > { %1332 = vmatpush.bf16.msra.mxu3 %v1302_v25 }
  0xa8   : > { %626 = vmatmul.bf16.gmra.mxu0 %v526_v60 }
  0xb8   : > { %631 = vmatmul.bf16.gmra.mxu0 %v527_v16 }
  0xe5   : > { %v607_v26 = vpop.f32.mrf.mxu0 }
  0xe6   : > { %v608_v29 = vadd.f32 %v1965_v27, %v607_v26  ;;  %v1301_v26 = vld [vmem:[#allocation10] sm:$0xff] }
  0xe7   : > { %887 = vmatpush.bf16.msra.mxu2 %v1301_v26  ;;  %1333 = vmatpush.bf16.msra.mxu3 %v1301_v26 }
  0xe8   : > { %v647_v32 = vmax.f32 %v608_v29, 0.0 }
  0xeb   : > { %v637_v28 = vpop.f32.mrf.mxu3 }
  0xec   : > { %v638_v34 = vadd.f32 %v1965_v27, %v637_v28 }
  0xed   : > { %v609_v30 = vpop.f32.mrf.mxu0 }
  0xee   : > { %v610_v31 = vadd.f32 %v1965_v27, %v609_v30  ;;  %v659_v37 = vmax.f32 %v638_v34, 0.0 }
  0xf0   : > { %v648_v33 = vmax.f32 %v610_v31, 0.0 }
  0xf2   : > { %v663_v35 = vpack.c.bf16 %v648_v33, %v647_v32 }
  0xf3   : > { %v639_v36 = vpop.f32.mrf.mxu3 }
  0xf4   : > { %747 = vmatmul.bf16.vlgmr.msra.gmra.mxu1 %v663_v35  ;;  %v640_v38 = vadd.f32 %v1965_v27, %v639_v36 }
  0xf5   : > { %v612_v39 = vpop.f32.mrf.mxu0 }
  0xf6   : > { %v660_v40 = vmax.f32 %v640_v38, 0.0  ;;  %v613_v42 = vadd.f32 %v1965_v27, %v612_v39 }
  0xf8   : > { %v669_v41 = vpack.c.bf16 %v660_v40, %v659_v37  ;;  %v649_v46 = vmax.f32 %v613_v42, 0.0 }
  0xfa   : > { %777 = vmatmul.bf16.vlgmr.msrb.gmra.mxu3 %v669_v41 }
  0xfb   : > { %v642_v45 = vpop.f32.mrf.mxu3 }
  0xfc   : > { %v643_v49 = vadd.f32 %v1965_v27, %v642_v45 }
  0xfd   : > { %v614_v43 = vpop.f32.mrf.mxu0 }
  0xfe   : > { %v615_v44 = vadd.f32 %v1965_v27, %v614_v43  ;;  %v661_v52 = vmax.f32 %v643_v49, 0.0 }
 0x100   : > { %v650_v47 = vmax.f32 %v615_v44, 0.0 }
 0x102   : > { %v664_v48 = vpack.c.bf16 %v650_v47, %v649_v46 }
 0x103   : > { %v644_v51 = vpop.f32.mrf.mxu3 }
 0x104   : > { %752 = vmatmul.bf16.gmra.mxu1 %v664_v48  ;;  %v645_v53 = vadd.f32 %v1965_v27, %v644_v51 }
 0x105   : > { %v617_v50 = vpop.f32.mrf.mxu0 }
 0x106   : > { %v662_v54 = vmax.f32 %v645_v53, 0.0  ;;  %v618_v55 = vadd.f32 %v1965_v27, %v617_v50 }
 0x108   : > { %v670_v56 = vpack.c.bf16 %v662_v54, %v661_v52  ;;  %v651_v59 = vmax.f32 %v618_v55, 0.0 }
 0x10a   : > { %782 = vmatmul.bf16.gmra.mxu3 %v670_v56 }
 0x10d   : > { %v619_v57 = vpop.f32.mrf.mxu0 }
 0x10e   : > { %v620_v58 = vadd.f32 %v1965_v27, %v619_v57 }
 0x110   : > { %v652_v60 = vmax.f32 %v620_v58, 0.0 }
 0x112   : > { %v665_v61 = vpack.c.bf16 %v652_v60, %v651_v59 }
 0x114   : > { %757 = vmatmul.bf16.gmra.mxu1 %v665_v61 }
 0x115   : > { %v622_v62 = vpop.f32.mrf.mxu0 }
 0x116   : > { %v623_v63 = vadd.f32 %v1965_v27, %v622_v62 }
 0x118   : > { %v653_v2 = vmax.f32 %v623_v63, 0.0 }
 0x11d   : > { %v624_v0 = vpop.f32.mrf.mxu0 }
 0x11e   : > { %v625_v1 = vadd.f32 %v1965_v27, %v624_v0 }
 0x120   : > { %v654_v3 = vmax.f32 %v625_v1, 0.0 }
 0x122   : > { %v666_v5 = vpack.c.bf16 %v654_v3, %v653_v2 }
 0x124   : > { %762 = vmatmul.bf16.gmra.mxu1 %v666_v5 }
 0x125   : > { %v627_v7 = vpop.f32.mrf.mxu0 }
 0x126   : > { %v628_v11 = vadd.f32 %v1965_v27, %v627_v7 }
 0x128   : > { %v655_v15 = vmax.f32 %v628_v11, 0.0 }
 0x12d   : > { %v629_v12 = vpop.f32.mrf.mxu0 }
 0x12e   : > { %v630_v13 = vadd.f32 %v1965_v27, %v629_v12 }
 0x130   : > { %v656_v16 = vmax.f32 %v630_v13, 0.0 }
 0x132   : > { %v667_v17 = vpack.c.bf16 %v656_v16, %v655_v15 }
 0x134   : > { %767 = vmatmul.bf16.gmra.mxu1 %v667_v17 }
 0x135   : > { %v632_v18 = vpop.f32.mrf.mxu0 }
 0x136   : > { %v633_v19 = vadd.f32 %v1965_v27, %v632_v18 }
 0x138   : > { %v657_v4 = vmax.f32 %v633_v19, 0.0 }
 0x13d   : > { %v634_v20 = vpop.f32.mrf.mxu0 }
 0x13e   : > { %v635_v21 = vadd.f32 %v1965_v27, %v634_v20  ;;  %v1440_v27 = vld [vmem:[%s2048_s5] ss:$0 sm:$0xff] }
 0x140   : > { %v658_v22 = vmax.f32 %v635_v21, 0.0 }
 0x142   : > { %v668_v10 = vpack.c.bf16 %v658_v22, %v657_v4  ;;  %v1441_v4 = vld [vmem:[%s2050_s7] ss:$0 sm:$0xff] }
 0x144   : > { %772 = vmatmul.bf16.gmra.mxu1 %v668_v10 }
 0x171   : > { %v748_v28 = vpop.f32.mrf.mxu1 }
 0x172   : > { %v749_v29 = vadd.f32 %v1440_v27, %v748_v28 }
 0x174   : > { %v788_v32 = vmax.f32 %v749_v29, 0.0 }
 0x179   : > { %v750_v30 = vpop.f32.mrf.mxu1 }
 0x17a   : > { %v751_v31 = vadd.f32 %v1440_v27, %v750_v30 }
 0x17c   : > { %v789_v33 = vmax.f32 %v751_v31, 0.0 }
 0x17d   : > { %v778_v34 = vpop.f32.mrf.mxu3 }
 0x17e   : > { %v804_v35 = vpack.c.bf16 %v789_v33, %v788_v32  ;;  %v779_v37 = vadd.f32 %v1440_v27, %v778_v34 }
 0x180   : > { %888 = vmatmul.bf16.vlgmr.msra.gmra.mxu2 %v804_v35  ;;  %v800_v39 = vmax.f32 %v779_v37, 0.0 }
 0x181   : > { %v753_v36 = vpop.f32.mrf.mxu1 }
 0x182   : > { %v754_v41 = vadd.f32 %v1440_v27, %v753_v36 }
 0x184   : > { %v790_v46 = vmax.f32 %v754_v41, 0.0 }
 0x185   : > { %v780_v38 = vpop.f32.mrf.mxu3 }
 0x186   : > { %v781_v40 = vadd.f32 %v1440_v27, %v780_v38 }
 0x188   : > { %v801_v42 = vmax.f32 %v781_v40, 0.0 }
 0x189   : > { %v755_v43 = vpop.f32.mrf.mxu1 }
 0x18a   : > { %v756_v44 = vadd.f32 %v1440_v27, %v755_v43  ;;  %v810_v45 = vpack.c.bf16 %v801_v42, %v800_v39 }
 0x18c   : > { %v791_v47 = vmax.f32 %v756_v44, 0.0  ;;  %918 = vmatmul.bf16.vlgmr.msra.gmra.mxu3 %v810_v45 }
 0x18d   : > { %v783_v50 = vpop.f32.mrf.mxu3 }
 0x18e   : > { %v805_v48 = vpack.c.bf16 %v791_v47, %v790_v46  ;;  %v784_v51 = vadd.f32 %v1440_v27, %v783_v50 }
 0x190   : > { %893 = vmatmul.bf16.gmra.mxu2 %v805_v48  ;;  %v802_v56 = vmax.f32 %v784_v51, 0.0 }
 0x191   : > { %v758_v49 = vpop.f32.mrf.mxu1 }
 0x192   : > { %v759_v52 = vadd.f32 %v1440_v27, %v758_v49 }
 0x194   : > { %v792_v58 = vmax.f32 %v759_v52, 0.0 }
 0x195   : > { %v785_v54 = vpop.f32.mrf.mxu3 }
 0x196   : > { %v786_v57 = vadd.f32 %v1440_v27, %v785_v54 }
 0x198   : > { %v803_v60 = vmax.f32 %v786_v57, 0.0 }
 0x199   : > { %v760_v53 = vpop.f32.mrf.mxu1 }
 0x19a   : > { %v761_v55 = vadd.f32 %v1440_v27, %v760_v53  ;;  %v811_v62 = vpack.c.bf16 %v803_v60, %v802_v56 }
 0x19c   : > { %v793_v59 = vmax.f32 %v761_v55, 0.0  ;;  %923 = vmatmul.bf16.gmra.mxu3 %v811_v62 }
 0x19e   : > { %v806_v61 = vpack.c.bf16 %v793_v59, %v792_v58 }
 0x1a0   : > { %898 = vmatmul.bf16.gmra.mxu2 %v806_v61 }
 0x1a1   : > { %v763_v63 = vpop.f32.mrf.mxu1 }
 0x1a2   : > { %v764_v0 = vadd.f32 %v1440_v27, %v763_v63 }
 0x1a4   : > { %v794_v3 = vmax.f32 %v764_v0, 0.0 }
 0x1a9   : > { %v765_v1 = vpop.f32.mrf.mxu1 }
 0x1aa   : > { %v766_v2 = vadd.f32 %v1440_v27, %v765_v1 }
 0x1ac   : > { %v795_v5 = vmax.f32 %v766_v2, 0.0 }
 0x1ae   : > { %v807_v6 = vpack.c.bf16 %v795_v5, %v794_v3 }
 0x1b0   : > { %903 = vmatmul.bf16.gmra.mxu2 %v807_v6 }
 0x1b1   : > { %v768_v7 = vpop.f32.mrf.mxu1 }
 0x1b2   : > { %v769_v8 = vadd.f32 %v1440_v27, %v768_v7 }
 0x1b4   : > { %v796_v12 = vmax.f32 %v769_v8, 0.0 }
 0x1b9   : > { %v770_v9 = vpop.f32.mrf.mxu1 }
 0x1ba   : > { %v771_v11 = vadd.f32 %v1440_v27, %v770_v9 }
 0x1bc   : > { %v797_v13 = vmax.f32 %v771_v11, 0.0 }
 0x1be   : > { %v808_v14 = vpack.c.bf16 %v797_v13, %v796_v12 }
 0x1c0   : > { %908 = vmatmul.bf16.gmra.mxu2 %v808_v14 }
 0x1c1   : > { %v773_v15 = vpop.f32.mrf.mxu1 }
 0x1c2   : > { %v774_v16 = vadd.f32 %v1440_v27, %v773_v15 }
 0x1c4   : > { %v798_v19 = vmax.f32 %v774_v16, 0.0 }
 0x1c9   : > { %v775_v17 = vpop.f32.mrf.mxu1 }
 0x1ca   : > { %v776_v18 = vadd.f32 %v1440_v27, %v775_v17 }
 0x1cc   : > { %v799_v20 = vmax.f32 %v776_v18, 0.0 }
 0x1ce   : > { %v809_v21 = vpack.c.bf16 %v799_v20, %v798_v19 }
 0x1d0   : > { %913 = vmatmul.bf16.gmra.mxu2 %v809_v21 }
 0x203   : > { %v889_v22 = vpop.f32.mrf.mxu2 }
 0x204   : > { %v890_v10 = vadd.f32 %v1441_v4, %v889_v22 }
 0x206   : > { %v929_v23 = vmul.f32 %v890_v10, %v890_v10 }
 0x208   : > { %945 = vadd.xlane.f32.xlu0 %v929_v23 }
 0x20b   : > { %v891_v24 = vpop.f32.mrf.mxu2 }
 0x20c   : > { %v892_v25 = vadd.f32 %v1441_v4, %v891_v24 }
 0x20e   : > { %v930_v26 = vmul.f32 %v892_v25, %v892_v25 }
 0x20f   : > { %v919_v28 = vpop.f32.mrf.mxu3 }
 0x210   : > { %947 = vadd.xlane.f32.xlu0 %v930_v26  ;;  %v920_v29 = vadd.f32 %v1441_v4, %v919_v28 }
 0x212   : > { %v941_v31 = vmul.f32 %v920_v29, %v920_v29 }
 0x213   : > { %v894_v30 = vpop.f32.mrf.mxu2 }
 0x214   : > { %v895_v27 = vadd.f32 %v1441_v4, %v894_v30 }
 0x216   : > { %v931_v32 = vmul.f32 %v895_v27, %v895_v27 }
 0x217   : > { %v921_v46 = vpop.f32.mrf.mxu3 }
 0x218   : > { %949 = vadd.xlane.f32.xlu1 %v931_v32  ;;  %969 = vadd.xlane.f32.xlu0 %v941_v31  ;;  %v922_v62 = vadd.f32 %v1441_v4, %v921_v46 }
 0x21a   : > { %v942_v1 = vmul.f32 %v922_v62, %v922_v62 }
 0x21b   : > { %v896_v33 = vpop.f32.mrf.mxu2 }
 0x21c   : > { %v897_v34 = vadd.f32 %v1441_v4, %v896_v33 }
 0x21e   : > { %v932_v35 = vmul.f32 %v897_v34, %v897_v34 }
 0x21f   : > { %v924_v51 = vpop.f32.mrf.mxu3 }
 0x220   : > { %951 = vadd.xlane.f32.xlu1 %v932_v35  ;;  %v925_v3 = vadd.f32 %v1441_v4, %v924_v51 }
 0x222   : > { %v943_v5 = vmul.f32 %v925_v3, %v925_v3 }
 0x223   : > { %v899_v36 = vpop.f32.mrf.mxu2 }
 0x224   : > { %v900_v37 = vadd.f32 %v1441_v4, %v899_v36 }
 0x226   : > { %v933_v38 = vmul.f32 %v900_v37, %v900_v37 }
 0x227   : > { %v926_v56 = vpop.f32.mrf.mxu3 }
 0x228   : > { %953 = vadd.xlane.f32.xlu2 %v933_v38  ;;  %v927_v57 = vadd.f32 %v1441_v4, %v926_v56 }
 0x22a   : > { %v944_v60 = vmul.f32 %v927_v57, %v927_v57 }
 0x22b   : > { %v901_v39 = vpop.f32.mrf.mxu2 }
 0x22c   : > { %v902_v40 = vadd.f32 %v1441_v4, %v901_v39 }
 0x22e   : > { %v934_v41 = vmul.f32 %v902_v40, %v902_v40 }
 0x230   : > { %955 = vadd.xlane.f32.xlu2 %v934_v41 }
 0x233   : > { %v904_v42 = vpop.f32.mrf.mxu2 }
 0x234   : > { %v905_v43 = vadd.f32 %v1441_v4, %v904_v42 }
 0x236   : > { %v935_v44 = vmul.f32 %v905_v43, %v905_v43 }
 0x238   : > { %957 = vadd.xlane.f32.xlu0 %v935_v44 }
 0x23b   : > { %v906_v45 = vpop.f32.mrf.mxu2 }
 0x23c   : > { %v907_v47 = vadd.f32 %v1441_v4, %v906_v45 }
 0x23e   : > { %v936_v48 = vmul.f32 %v907_v47, %v907_v47 }
 0x240   : > { %959 = vadd.xlane.f32.xlu1 %v936_v48 }
 0x243   : > { %v909_v49 = vpop.f32.mrf.mxu2 }
 0x244   : > { %v910_v50 = vadd.f32 %v1441_v4, %v909_v49 }
 0x246   : > { %v937_v52 = vmul.f32 %v910_v50, %v910_v50 }
 0x248   : > { %961 = vadd.xlane.f32.xlu2 %v937_v52 }
 0x24b   : > { %v911_v53 = vpop.f32.mrf.mxu2 }
 0x24c   : > { %v912_v54 = vadd.f32 %v1441_v4, %v911_v53 }
 0x24e   : > { %v938_v55 = vmul.f32 %v912_v54, %v912_v54 }
 0x250   : > { %963 = vadd.xlane.f32.xlu0 %v938_v55 }
 0x253   : > { %v914_v58 = vpop.f32.mrf.mxu2 }
 0x254   : > { %v915_v59 = vadd.f32 %v1441_v4, %v914_v58 }
 0x256   : > { %v939_v61 = vmul.f32 %v915_v59, %v915_v59 }
 0x258   : > { %965 = vadd.xlane.f32.xlu1 %v939_v61  ;;  %975 = vadd.xlane.f32.xlu0 %v944_v60 }
 0x25b   : > { %v916_v63 = vpop.f32.mrf.mxu2 }
 0x25c   : > { %v917_v0 = vadd.f32 %v1441_v4, %v916_v63 }
 0x25e   : > { %v940_v2 = vmul.f32 %v917_v0, %v917_v0 }
 0x260   : > { %967 = vadd.xlane.f32.xlu2 %v940_v2  ;;  %971 = vadd.xlane.f32.xlu1 %v942_v1 }
 0x268   : > { %973 = vadd.xlane.f32.xlu2 %v943_v5 }
 0x27b   : > { %v946_v6 = vpop.xlane.xlu0 %945 }
 0x27c   : > { %v977_v7 = vmul.f32 0.025, %v946_v6 }
 0x27e   : > { %993 = vst [vmem:[%s1991_s22] sm:$0xff] %v977_v7 }
 0x283   : > { %v948_v8 = vpop.xlane.xlu0 %947 }
 0x284   : > { %v978_v9 = vmul.f32 0.025, %v948_v8 }
 0x286   : > { %994 = vst [vmem:[%s1991_s22 + $0x8] sm:$0xff] %v978_v9 }
 0x28b   : > { %v950_v11 = vpop.xlane.xlu1 %949  ;;  %v970_v12 = vpop.xlane.xlu0 %969 }
 0x28c   : > { %v979_v13 = vmul.f32 0.025, %v950_v11  ;;  %v989_v14 = vmul.f32 0.025, %v970_v12 }
 0x28e   : > { %995 = vst [vmem:[%s1991_s22 + $0x10] sm:$0xff] %v979_v13 }
 0x28f   : > { %1005 = vst [vmem:[%s1991_s22 + $0x60] sm:$0xff] %v989_v14 }
 0x293   : > { %v952_v15 = vpop.xlane.xlu1 %951 }
 0x294   : > { %v980_v16 = vmul.f32 0.025, %v952_v15 }
 0x296   : > { %996 = vst [vmem:[%s1991_s22 + $0x18] sm:$0xff] %v980_v16 }
 0x29b   : > { %v954_v17 = vpop.xlane.xlu2 %953 }
 0x29c   : > { %v981_v18 = vmul.f32 0.025, %v954_v17 }
 0x29e   : > { %997 = vst [vmem:[%s1991_s22 + $0x20] sm:$0xff] %v981_v18 }
 0x2a3   : > { %v956_v19 = vpop.xlane.xlu2 %955 }
 0x2a4   : > { %v982_v20 = vmul.f32 0.025, %v956_v19 }
 0x2a6   : > { %998 = vst [vmem:[%s1991_s22 + $0x28] sm:$0xff] %v982_v20 }
 0x2ab   : > { %v958_v21 = vpop.xlane.xlu0 %957 }
 0x2ac   : > { %v983_v4 = vmul.f32 0.025, %v958_v21 }
 0x2ae   : > { %999 = vst [vmem:[%s1991_s22 + $0x30] sm:$0xff] %v983_v4 }
 0x2b3   : > { %v960_v22 = vpop.xlane.xlu1 %959 }
 0x2b4   : > { %v984_v10 = vmul.f32 0.025, %v960_v22 }
 0x2b6   : > { %1000 = vst [vmem:[%s1991_s22 + $0x38] sm:$0xff] %v984_v10 }
 0x2bb   : > { %v962_v23 = vpop.xlane.xlu2 %961 }
 0x2bc   : > { %v985_v24 = vmul.f32 0.025, %v962_v23 }
 0x2be   : > { %1001 = vst [vmem:[%s1991_s22 + $0x40] sm:$0xff] %v985_v24 }
 0x2c3   : > { %v964_v25 = vpop.xlane.xlu0 %963 }
 0x2c4   : > { %v986_v26 = vmul.f32 0.025, %v964_v25 }
 0x2c6   : > { %1002 = vst [vmem:[%s1991_s22 + $0x48] sm:$0xff] %v986_v26 }
 0x2cb   : > { %v966_v28 = vpop.xlane.xlu1 %965  ;;  %v976_v29 = vpop.xlane.xlu0 %975 }
 0x2cc   : > { %v987_v30 = vmul.f32 0.025, %v966_v28  ;;  %v992_v27 = vmul.f32 0.025, %v976_v29 }
 0x2ce   : > { %1003 = vst [vmem:[%s1991_s22 + $0x50] sm:$0xff] %v987_v30 }
 0x2cf   : > { %1008 = vst [vmem:[%s1991_s22 + $0x78] sm:$0xff] %v992_v27 }
 0x2d3   : > { %v968_v31 = vpop.xlane.xlu2 %967  ;;  %v972_v32 = vpop.xlane.xlu1 %971 }
 0x2d4   : > { %v988_v33 = vmul.f32 0.025, %v968_v31  ;;  %v990_v34 = vmul.f32 0.025, %v972_v32 }
 0x2d6   : > { %1004 = vst [vmem:[%s1991_s22 + $0x58] sm:$0xff] %v988_v33 }
 0x2d7   : > { %1006 = vst [vmem:[%s1991_s22 + $0x68] sm:$0xff] %v990_v34 }
 0x2db   : > { %v974_v35 = vpop.xlane.xlu2 %973 }
 0x2dc   : > { %v991_v36 = vmul.f32 0.025, %v974_v35 }
 0x2de   : > { %1007 = vst [vmem:[%s1991_s22 + $0x70] sm:$0xff] %v991_v36 }
 0x2df   : > { %1649 = shalt.err (!%p1646_p9)
}
 0x2e0   : > { %s1711_s0 = smov 128   ;;  %s1712_s25 = smov 8  }
 0x2e1   : > { %1356 = dma.vmem_to_hbm [thread:$0]  (%p1853_p0), %s1023_s14, 2048, %s1025_s1, %s1010_s2, %s1711_s0, %s1711_s0, %s1712_s25  }
 0x2e2 PF: > { %s1039_s22 = sand.u32 1, %s1688_s30   ;;  %p2068_p10 = scmp.ge.s32.totalorder %s1700_s12, 2 }
 0x2e3   : > { %s1040_s27 = scalar_lea.sflag [#allocation4], %s1039_s22 }
 0x2e4   : > { %p1379_p11 = pnand %p2068_p10, %p1859_p6 }
 0x2e6   : > { %p1380_p12 = pneg %p1379_p11 }
 0x2e8   : > { %1683 = dma.done.wait (%p1380_p12), %s1040_s27, 2048  }
 0x2e9   : > { %1685 = vsyncadd (%p1380_p12), %s1040_s27, 4294965248  ;;  %p25_p2 = scmp.ge.s32.totalorder %s1829_s18, 4   ;;  %s2069_s30 = smov %s1692_s10 }
 0x2ea   : > { %s2070_s10 = smov %s1696_s11  ;;  %s2071_s11 = smov %s1841_s20 }
 0x2eb   : > { %s2072_s12 = smov %s1829_s18  ;;  %27 = sbr.rel (!%p25_p2) target bundleno = 13 (0xd), region = 122 }
 0x2f0   :  { %1046 = vsyncpa [#allocation3], 1 }
 0x2f1   :  { %1048 = vsyncpa [#allocation3 + $0x1], 1 }
 0x2f2   :  { %1049 = vsyncpa [#allocation6], 1 }
 0x2f3   :  { %1050 = vsyncpa [#allocation9], 1 }
 0x2f4   :  { %1051 = vsyncpa [#allocation12], 1 }
 0x2f5   :  { %1053 = vsyncpa [#allocation12 + $0x1], 1 }
 0x2f6   :  { %1054 = vsyncpa [#allocation4], 1 }
 0x2f7   :  { %1056 = vsyncpa [#allocation4 + $0x1], 1 }

</bundles_post_ra>
